<compile_context>
chip_gen: v5e
topology: v5e:2x2
jax: 0.10.0
libtpu: 0.0.40
codegen_flags: <defaults>
</compile_context>

<pallas_src>
import jax
import jax.numpy as jnp
from jax.experimental import pallas as pl
from jax.experimental.pallas import tpu as pltpu


def _make_kernel(B, C, H, W):
    Ho, Wo = H - 2, W - 2
    HW = H * W
    BC = B * C
    inv_cnt = 1.0 / float(B * Ho * Wo)
    eps = 2e-5

    def kernel(p_ref, x_ref, aux_ref, out_ref):
        # ---- Hoisted scalar params (SMEM) ---------------------------------
        conv_b = p_ref[0]
        gamma = p_ref[1]
        beta = p_ref[2]
        fc_b = p_ref[3]

        # (B*C, H*W) activation slab -- uses all 8 sublanes.
        xs = x_ref[...].astype(jnp.float32)

        # ---- Conv2d(C -> 1, kernel=3, stride=1, valid), lane-dense ---------
        # Output position p = i*W + j (i < Ho, j < Wo) needs tap x[p + dy*W+dx]
        # in every (b, c) row.  The per-(b, c) tap weight is a (BC, 1) column
        # (lane broadcast); rolling by -(dy*W+dx) along lanes aligns the tap
        # with p.  Garbage outside the valid window is masked later.
        acc = None
        for dy in range(3):
            for dx in range(3):
                kw = dy * 3 + dx            # index into the 3x3 kernel taps
                shift = dy * W + dx         # flat offset inside the slab
                tap = xs * aux_ref[0:BC, kw:kw + 1]
                if shift != 0:
                    tap = pltpu.roll(tap, shift=HW - shift, axis=1)
                acc = tap if acc is None else acc + tap

        # Channel reduction: rows b*C .. b*C+C-1 -> one (1, HW) row per batch.
        ys = [jnp.sum(acc[b * C:(b + 1) * C, :], axis=0, keepdims=True)
              for b in range(B)]
        y = jnp.concatenate(ys, axis=0) + conv_b          # (B, HW)

        maskf = aux_ref[BC:BC + 1, :]        # (1, HW) valid (Ho, Wo) window
        fcw = aux_ref[BC + 1:BC + 2, :]      # (1, HW) scattered fc weights

        # ---- BatchNorm2d(1, eps=2e-5), train-mode batch stats --------------
        ym = y * maskf
        stacked = jnp.concatenate([ym, ym * ym], axis=0)  # (2B, HW)
        red = jnp.sum(stacked, axis=-1, keepdims=True)    # (2B, 1) one lane reduce
        s = jnp.sum(red[0:B], axis=0, keepdims=True)      # (1, 1)  sum(y)
        q = jnp.sum(red[B:2 * B], axis=0, keepdims=True)  # (1, 1)  sum(y*y)
        mean = s * inv_cnt
        var = jnp.maximum(q * inv_cnt - mean * mean, 0.0)  # biased var, clamped
        scale = jax.lax.rsqrt(var + eps) * gamma
        yhat = (y - mean) * scale + beta

        # ---- ReLU ------------------------------------------------------------
        r = jnp.maximum(yhat, 0.0)

        # ---- Linear((Ho*Wo) -> 1): fc weights pre-scattered into the (H, W)
        # slab (zeros outside the valid window) -> one lane reduce per row.
        z = jnp.sum(r * fcw, axis=-1, keepdims=True) + fc_b   # (B, 1)

        # ---- Softplus (beta=1, threshold=20, as in PyTorch) -----------------
        sp = jnp.log1p(jnp.exp(jnp.minimum(z, 20.0)))
        out_ref[...] = jnp.where(z > 20.0, z, sp)

    return kernel


@jax.jit
def scale_module_forward(x, conv_w, conv_b, bn_gamma, bn_beta, fc_w, fc_b):
    """x: (B, C, H, W). Returns (B, 1) float32."""
    B, C, H, W = x.shape
    Ho, Wo = H - 2, W - 2
    HW = H * W
    BC = B * C

    # Free reshape (no data movement): (B, C, H, W) -> (B*C, H*W).
    x_r = x.reshape(BC, HW)

    # Scalars for SMEM: [conv_bias, bn_gamma, bn_beta, fc_bias].
    params = jnp.stack(
        [conv_b[0], bn_gamma[0], bn_beta[0], fc_b[0]]).astype(jnp.float32)

    # One auxiliary VMEM slab (BC+2, HW):
    #   rows 0..BC-1, lanes 0..8 : per-(b, c) conv tap weights (tiled over B so
    #                              row b*C + c matches x_r's row ordering)
    #   row  BC                  : validity mask of the (Ho, Wo) output window
    #   row  BC+1                : fc weights scattered into the (H, W) layout
    wcol = jnp.tile(conv_w.reshape(C, 9).astype(jnp.float32), (B, 1))
    mask2d = jnp.zeros((H, W), jnp.float32).at[:Ho, :Wo].set(1.0)
    fcw2d = jnp.zeros((H, W), jnp.float32).at[:Ho, :Wo].set(
        fc_w.reshape(Ho, Wo).astype(jnp.float32))
    aux = jnp.zeros((BC + 2, HW), jnp.float32)
    aux = aux.at[:BC, :9].set(wcol)
    aux = aux.at[BC, :].set(mask2d.reshape(HW))
    aux = aux.at[BC + 1, :].set(fcw2d.reshape(HW))

    kernel = _make_kernel(B, C, H, W)

    # TODO(synk): for large batches, add a grid over B (blocks of (TB, HW),
    # dimension_semantics=("parallel",)) with a two-phase BN (stats pass, then
    # normalize) to use both v7x TensorCores; at B=2 one invocation is optimal.
    return pl.pallas_call(
        kernel,
        out_shape=jax.ShapeDtypeStruct((B, 1), jnp.float32),
        in_specs=[
            pl.BlockSpec(memory_space=pltpu.MemorySpace.SMEM),   # scalar params
            pl.BlockSpec(memory_space=pltpu.MemorySpace.VMEM),   # x as (B*C, H*W)
            pl.BlockSpec(memory_space=pltpu.MemorySpace.VMEM),   # aux slab
        ],
        out_specs=pl.BlockSpec(memory_space=pltpu.MemorySpace.VMEM),
    )(params, x_r, aux)


def _reference_forward(x, conv_w, conv_b, bn_gamma, bn_beta, fc_w, fc_b):
    """Pure-JAX reference mirroring the PyTorch forward (train-mode BN)."""
    B, C, H, W = x.shape
    Ho, Wo = H - 2, W - 2
    y = jnp.zeros((B, Ho, Wo), jnp.float32)
    for c in range(C):
        for dy in range(3):
            for dx in range(3):
                y = y + x[:, c, dy:dy + Ho, dx:dx + Wo] * conv_w[0, c, dy, dx]
    y = y + conv_b[0]
    mean = jnp.mean(y)
    var = jnp.mean((y - mean) ** 2)
    y = (y - mean) * jax.lax.rsqrt(var + 2e-5) * bn_gamma[0] + bn_beta[0]
    y = jnp.maximum(y, 0.0)
    z = y.reshape(B, -1) @ fc_w.reshape(-1)[:, None] + fc_b[0]
    return jnp.where(z > 20.0, z, jnp.log1p(jnp.exp(jnp.minimum(z, 20.0))))


if __name__ == "__main__":
    B, C, H = 2, 4, 16          # batch=2, in_features=4, map_size=16
    Ho = H - 2

    key = jax.random.PRNGKey(0)
    kx, k1, k2, k3, k4 = jax.random.split(key, 5)

    x = jax.random.normal(kx, (B, C, H, H), dtype=jnp.float32)

    # Deterministic synthetic parameters (shapes match the nn.Module's __init__).
    conv_w = 0.1 * jax.random.normal(k1, (1, C, 3, 3), dtype=jnp.float32)
    conv_b = 0.1 * jax.random.normal(k2, (1,), dtype=jnp.float32)
    bn_gamma = jnp.ones((1,), jnp.float32)
    bn_beta = jnp.zeros((1,), jnp.float32)
    fc_w = 0.1 * jax.random.normal(k3, (1, Ho * Ho), dtype=jnp.float32)
    fc_b = 0.1 * jax.random.normal(k4, (1,), dtype=jnp.float32)

    out = scale_module_forward(x, conv_w, conv_b, bn_gamma, bn_beta, fc_w, fc_b)
    out = jax.block_until_ready(out)

    ref = _reference_forward(x, conv_w, conv_b, bn_gamma, bn_beta, fc_w, fc_b)
    assert out.shape == (B, 1)
    assert jnp.allclose(out, ref, atol=1e-4, rtol=1e-4), (out, ref)

    print("KERNEL_OK")
</pallas_src>

<mosaic_0001>
module attributes {stable_mosaic.version = 11 : i64} {
  func.func @kernel(%arg0: memref<4xf32, #tpu.memory_space<smem>>, %arg1: memref<8x256xf32, #tpu.memory_space<vmem>>, %arg2: memref<10x256xf32, #tpu.memory_space<vmem>>, %arg3: memref<2x1xf32, #tpu.memory_space<vmem>>) attributes {dimension_semantics = [], scalar_prefetch = 0 : i64, scratch_operands = 0 : i64, tpu.core_type = #tpu.core_type<tc>} {
    %c0 = arith.constant 0 : index
    %0 = memref.load %arg0[%c0] : memref<4xf32, #tpu.memory_space<smem>>
    %c1 = arith.constant 1 : index
    %1 = memref.load %arg0[%c1] : memref<4xf32, #tpu.memory_space<smem>>
    %c2 = arith.constant 2 : index
    %2 = memref.load %arg0[%c2] : memref<4xf32, #tpu.memory_space<smem>>
    %c3 = arith.constant 3 : index
    %3 = memref.load %arg0[%c3] : memref<4xf32, #tpu.memory_space<smem>>
    %c0_0 = arith.constant 0 : index
    %c0_1 = arith.constant 0 : index
    %4 = vector.load %arg1[%c0_0, %c0_1] : memref<8x256xf32, #tpu.memory_space<vmem>>, vector<8x256xf32>
    %c0_2 = arith.constant 0 : index
    %c0_3 = arith.constant 0 : index
    %5 = vector.load %arg2[%c0_2, %c0_3] : memref<10x256xf32, #tpu.memory_space<vmem>>, vector<8x1xf32>
    %6 = vector.broadcast %5 : vector<8x1xf32> to vector<8x256xf32>
    %7 = arith.mulf %4, %6 : vector<8x256xf32>
    %c0_4 = arith.constant 0 : index
    %c1_5 = arith.constant 1 : index
    %8 = vector.load %arg2[%c0_4, %c1_5] : memref<10x256xf32, #tpu.memory_space<vmem>>, vector<8x1xf32>
    %9 = vector.broadcast %8 : vector<8x1xf32> to vector<8x256xf32>
    %10 = arith.mulf %4, %9 : vector<8x256xf32>
    %c255_i32 = arith.constant 255 : i32
    %11 = tpu.dynamic_rotate %10 by %c255_i32 dim 1 : vector<8x256xf32>, i32 -> vector<8x256xf32>
    %12 = arith.addf %7, %11 : vector<8x256xf32>
    %c0_6 = arith.constant 0 : index
    %c2_7 = arith.constant 2 : index
    %13 = vector.load %arg2[%c0_6, %c2_7] : memref<10x256xf32, #tpu.memory_space<vmem>>, vector<8x1xf32>
    %14 = vector.broadcast %13 : vector<8x1xf32> to vector<8x256xf32>
    %15 = arith.mulf %4, %14 : vector<8x256xf32>
    %c254_i32 = arith.constant 254 : i32
    %16 = tpu.dynamic_rotate %15 by %c254_i32 dim 1 : vector<8x256xf32>, i32 -> vector<8x256xf32>
    %17 = arith.addf %12, %16 : vector<8x256xf32>
    %c0_8 = arith.constant 0 : index
    %c3_9 = arith.constant 3 : index
    %18 = vector.load %arg2[%c0_8, %c3_9] : memref<10x256xf32, #tpu.memory_space<vmem>>, vector<8x1xf32>
    %19 = vector.broadcast %18 : vector<8x1xf32> to vector<8x256xf32>
    %20 = arith.mulf %4, %19 : vector<8x256xf32>
    %c240_i32 = arith.constant 240 : i32
    %21 = tpu.dynamic_rotate %20 by %c240_i32 dim 1 : vector<8x256xf32>, i32 -> vector<8x256xf32>
    %22 = arith.addf %17, %21 : vector<8x256xf32>
    %c0_10 = arith.constant 0 : index
    %c4 = arith.constant 4 : index
    %23 = vector.load %arg2[%c0_10, %c4] : memref<10x256xf32, #tpu.memory_space<vmem>>, vector<8x1xf32>
    %24 = vector.broadcast %23 : vector<8x1xf32> to vector<8x256xf32>
    %25 = arith.mulf %4, %24 : vector<8x256xf32>
    %c239_i32 = arith.constant 239 : i32
    %26 = tpu.dynamic_rotate %25 by %c239_i32 dim 1 : vector<8x256xf32>, i32 -> vector<8x256xf32>
    %27 = arith.addf %22, %26 : vector<8x256xf32>
    %c0_11 = arith.constant 0 : index
    %c5 = arith.constant 5 : index
    %28 = vector.load %arg2[%c0_11, %c5] : memref<10x256xf32, #tpu.memory_space<vmem>>, vector<8x1xf32>
    %29 = vector.broadcast %28 : vector<8x1xf32> to vector<8x256xf32>
    %30 = arith.mulf %4, %29 : vector<8x256xf32>
    %c238_i32 = arith.constant 238 : i32
    %31 = tpu.dynamic_rotate %30 by %c238_i32 dim 1 : vector<8x256xf32>, i32 -> vector<8x256xf32>
    %32 = arith.addf %27, %31 : vector<8x256xf32>
    %c0_12 = arith.constant 0 : index
    %c6 = arith.constant 6 : index
    %33 = vector.load %arg2[%c0_12, %c6] : memref<10x256xf32, #tpu.memory_space<vmem>>, vector<8x1xf32>
    %34 = vector.broadcast %33 : vector<8x1xf32> to vector<8x256xf32>
    %35 = arith.mulf %4, %34 : vector<8x256xf32>
    %c224_i32 = arith.constant 224 : i32
    %36 = tpu.dynamic_rotate %35 by %c224_i32 dim 1 : vector<8x256xf32>, i32 -> vector<8x256xf32>
    %37 = arith.addf %32, %36 : vector<8x256xf32>
    %c0_13 = arith.constant 0 : index
    %c7 = arith.constant 7 : index
    %38 = vector.load %arg2[%c0_13, %c7] : memref<10x256xf32, #tpu.memory_space<vmem>>, vector<8x1xf32>
    %39 = vector.broadcast %38 : vector<8x1xf32> to vector<8x256xf32>
    %40 = arith.mulf %4, %39 : vector<8x256xf32>
    %c223_i32 = arith.constant 223 : i32
    %41 = tpu.dynamic_rotate %40 by %c223_i32 dim 1 : vector<8x256xf32>, i32 -> vector<8x256xf32>
    %42 = arith.addf %37, %41 : vector<8x256xf32>
    %c0_14 = arith.constant 0 : index
    %c8 = arith.constant 8 : index
    %43 = vector.load %arg2[%c0_14, %c8] : memref<10x256xf32, #tpu.memory_space<vmem>>, vector<8x1xf32>
    %44 = vector.broadcast %43 : vector<8x1xf32> to vector<8x256xf32>
    %45 = arith.mulf %4, %44 : vector<8x256xf32>
    %c222_i32 = arith.constant 222 : i32
    %46 = tpu.dynamic_rotate %45 by %c222_i32 dim 1 : vector<8x256xf32>, i32 -> vector<8x256xf32>
    %47 = arith.addf %42, %46 : vector<8x256xf32>
    %48 = vector.extract_strided_slice %47 {offsets = [0, 0], sizes = [4, 256], strides = [1, 1]} : vector<8x256xf32> to vector<4x256xf32>
    %cst = arith.constant dense<0.000000e+00> : vector<256xf32>
    %49 = vector.multi_reduction <add>, %48, %cst [0] : vector<4x256xf32> to vector<256xf32>
    %50 = vector.shape_cast %49 : vector<256xf32> to vector<1x256xf32>
    %51 = vector.extract_strided_slice %47 {offsets = [4, 0], sizes = [4, 256], strides = [1, 1]} : vector<8x256xf32> to vector<4x256xf32>
    %cst_15 = arith.constant dense<0.000000e+00> : vector<256xf32>
    %52 = vector.multi_reduction <add>, %51, %cst_15 [0] : vector<4x256xf32> to vector<256xf32>
    %53 = vector.shape_cast %52 : vector<256xf32> to vector<1x256xf32>
    %54 = tpu.concatenate %50, %53 in 0 : vector<1x256xf32>, vector<1x256xf32> -> vector<2x256xf32>
    %55 = vector.broadcast %0 : f32 to vector<2x256xf32>
    %56 = arith.addf %54, %55 : vector<2x256xf32>
    %c8_16 = arith.constant 8 : index
    %c0_17 = arith.constant 0 : index
    %57 = vector.load %arg2[%c8_16, %c0_17] : memref<10x256xf32, #tpu.memory_space<vmem>>, vector<1x256xf32>
    %c9 = arith.constant 9 : index
    %c0_18 = arith.constant 0 : index
    %58 = vector.load %arg2[%c9, %c0_18] : memref<10x256xf32, #tpu.memory_space<vmem>>, vector<1x256xf32>
    %59 = vector.broadcast %57 : vector<1x256xf32> to vector<2x256xf32>
    %60 = arith.mulf %56, %59 : vector<2x256xf32>
    %61 = arith.mulf %60, %60 : vector<2x256xf32>
    %62 = tpu.concatenate %60, %61 in 0 : vector<2x256xf32>, vector<2x256xf32> -> vector<4x256xf32>
    %cst_19 = arith.constant dense<0.000000e+00> : vector<4xf32>
    %63 = vector.multi_reduction <add>, %62, %cst_19 [1] : vector<4x256xf32> to vector<4xf32>
    %64 = vector.shape_cast %63 : vector<4xf32> to vector<4x1xf32>
    %65 = vector.extract_strided_slice %64 {offsets = [0, 0], sizes = [2, 1], strides = [1, 1]} : vector<4x1xf32> to vector<2x1xf32>
    %cst_20 = arith.constant dense<0.000000e+00> : vector<1xf32>
    %66 = vector.multi_reduction <add>, %65, %cst_20 [0] : vector<2x1xf32> to vector<1xf32>
    %67 = vector.shape_cast %66 : vector<1xf32> to vector<1x1xf32>
    %68 = vector.extract_strided_slice %64 {offsets = [2, 0], sizes = [2, 1], strides = [1, 1]} : vector<4x1xf32> to vector<2x1xf32>
    %cst_21 = arith.constant dense<0.000000e+00> : vector<1xf32>
    %69 = vector.multi_reduction <add>, %68, %cst_21 [0] : vector<2x1xf32> to vector<1xf32>
    %70 = vector.shape_cast %69 : vector<1xf32> to vector<1x1xf32>
    %cst_22 = arith.constant 0.00255102036 : f32
    %71 = vector.broadcast %cst_22 : f32 to vector<1x1xf32>
    %72 = arith.mulf %67, %71 : vector<1x1xf32>
    %cst_23 = arith.constant 0.00255102036 : f32
    %73 = vector.broadcast %cst_23 : f32 to vector<1x1xf32>
    %74 = arith.mulf %70, %73 : vector<1x1xf32>
    %75 = arith.mulf %72, %72 : vector<1x1xf32>
    %76 = arith.subf %74, %75 : vector<1x1xf32>
    %cst_24 = arith.constant 0.000000e+00 : f32
    %77 = vector.broadcast %cst_24 : f32 to vector<1x1xf32>
    %78 = arith.maximumf %76, %77 : vector<1x1xf32>
    %cst_25 = arith.constant 2.000000e-05 : f32
    %79 = vector.broadcast %cst_25 : f32 to vector<1x1xf32>
    %80 = arith.addf %78, %79 : vector<1x1xf32>
    %81 = math.rsqrt %80 : vector<1x1xf32>
    %82 = vector.broadcast %1 : f32 to vector<1x1xf32>
    %83 = arith.mulf %81, %82 : vector<1x1xf32>
    %84 = vector.broadcast %72 : vector<1x1xf32> to vector<2x256xf32>
    %85 = arith.subf %56, %84 : vector<2x256xf32>
    %86 = vector.broadcast %83 : vector<1x1xf32> to vector<2x256xf32>
    %87 = arith.mulf %85, %86 : vector<2x256xf32>
    %88 = vector.broadcast %2 : f32 to vector<2x256xf32>
    %89 = arith.addf %87, %88 : vector<2x256xf32>
    %cst_26 = arith.constant 0.000000e+00 : f32
    %90 = vector.broadcast %cst_26 : f32 to vector<2x256xf32>
    %91 = arith.maximumf %89, %90 : vector<2x256xf32>
    %92 = vector.broadcast %58 : vector<1x256xf32> to vector<2x256xf32>
    %93 = arith.mulf %91, %92 : vector<2x256xf32>
    %cst_27 = arith.constant dense<0.000000e+00> : vector<2xf32>
    %94 = vector.multi_reduction <add>, %93, %cst_27 [1] : vector<2x256xf32> to vector<2xf32>
    %95 = vector.shape_cast %94 : vector<2xf32> to vector<2x1xf32>
    %96 = vector.broadcast %3 : f32 to vector<2x1xf32>
    %97 = arith.addf %95, %96 : vector<2x1xf32>
    %cst_28 = arith.constant 2.000000e+01 : f32
    %98 = vector.broadcast %cst_28 : f32 to vector<2x1xf32>
    %99 = arith.minimumf %97, %98 : vector<2x1xf32>
    %100 = math.exp %99 : vector<2x1xf32>
    %101 = math.log1p %100 : vector<2x1xf32>
    %cst_29 = arith.constant 2.000000e+01 : f32
    %102 = vector.broadcast %cst_29 : f32 to vector<2x1xf32>
    %103 = arith.cmpf ogt, %97, %102 : vector<2x1xf32>
    %104 = arith.select %103, %97, %101 : vector<2x1xi1>, vector<2x1xf32>
    %c0_30 = arith.constant 0 : index
    %c0_31 = arith.constant 0 : index
    %105 = vector.load %arg3[%c0_30, %c0_31] : memref<2x1xf32, #tpu.memory_space<vmem>>, vector<2x1xf32>
    tpu.vector_store %arg3[%c0_30, %c0_31], %104 {strides = array<i32>} : memref<2x1xf32, #tpu.memory_space<vmem>>, vector<2x1xf32>,
    return
  }
}

</mosaic_0001>

<bundles_post_ra>
// kernel: scale_module_forward.1
= control target key start
LH: loop header
LB: loop body
LE: loop exit
PB: predicated region body
PF: predicated region fallthrough
CT: control target
= control target key end

     0   :  { %8 = vsyncpa [#allocation3], 0  ;;  %s363_s15 = smov [#allocation2]   ;;  %s434_s0 = inlined_call_operand.vmem [shape: f32[4], index: 0, kind: input, shape index: {}]   ;;  %s435_s1 = inlined_call_operand.vmem [shape: f32[8,256], index: 1, kind: input, shape index: {}]   ;;  %s436_s2 = inlined_call_operand.vmem [shape: f32[10,256], index: 2, kind: input, shape index: {}]   ;;  %s437_s3 = inlined_call_operand.vmem [shape: f32[2,1], index: 3, kind: output, shape index: {}]  }
   0x1   :  { %s14_s14 = sshll.u32 %s434_s0, 4  ;;  %s15_s14 = int_to_ptr.vmem [resolvable:$true] %s14_s14 }
   0x2   :  { %17 = dma.vmem_to_smem %s15_s14, 16, %s363_s15, [#allocation3]  }
   0x3   :  { %361 = dma.done.wait [#allocation3], 16  }
   0x4   :  { %362 = vsyncadd [#allocation3], 4294967280 }
   0x5   :  { %26 = sfence }
   0x6   :  { %v33_v0 = vld [vmem:[%s436_s2] sm:$0xff]  ;;  %v364_v1 = vmov 3   ;;  %v365_v2 = vmov 1   ;;  %v366_v3 = vmov 5   ;;  %v367_v4 = vmov 4   ;;  %v32_v11 = vld [vmem:[%s435_s1 + $0x8] sm:$0xff] }
   0x7   :  { %335 = vset.pattern.permute.xlu1 %v364_v1  ;;  %333 = vset.pattern.permute.xlu0 %v365_v2  ;;  %v368_v5 = vmov 2   ;;  %v369_v6 = vmov 6   ;;  %v370_v7 = vmov 7   ;;  %v371_v8 = vmov 0   ;;  %v31_v10 = vld [vmem:[%s435_s1] sm:$0xff]  ;;  %s373_s21 = smov 127  }
   0x8   :  { %74 = vperm.xlu1 %335, %v33_v0   ;;  %42 = vperm.xlu0 %333, %v33_v0   ;;  %v372_v9 = vmov 8   ;;  %s374_s22 = smov 112   ;;  %s375_s23 = smov 126   ;;  %v51_v43 = vlaneseq  ;;  %vm163_vm8 = vcmask 1043456   ;;  %vm198_vm9 = vcmask 1040384  }
   0x9   :  { %337 = vset.pattern.permute.xlu2 %v366_v3  ;;  %s376_s24 = smov 111   ;;  %s377_s1 = smov 96   ;;  %vm223_vm10 = vcmask 1041408   ;;  %vm303_vm14 = vcmask 1024  }
   0xa   :  { %104 = vperm.xlu2 %337, %v33_v0   ;;  %s378_s25 = smov 110   ;;  %s379_s26 = smov 95   ;;  %v52_v44 = vand.u32 127, %v51_v43 }
   0xb   :  { %s380_s27 = smov 94   ;;  %s27_s28 = sld [smem:[#allocation2]] }
   0xc   :  { %vm53_vm0 = vcmp.lt.s32.totalorder %v52_v44, 127  ;;  %vm68_vm1 = vcmp.lt.s32.totalorder %v52_v44, 126  ;;  %vm83_vm2 = vcmp.lt.s32.totalorder %v52_v44, 112  ;;  %vm98_vm3 = vcmp.lt.s32.totalorder %v52_v44, 111  ;;  %s310_s4 = sld [smem:[#allocation2 + $0x1]] }
   0xd   :  { %vm113_vm4 = vcmp.lt.s32.totalorder %v52_v44, 110  ;;  %vm128_vm5 = vcmp.lt.s32.totalorder %v52_v44, 96  ;;  %vm143_vm6 = vcmp.lt.s32.totalorder %v52_v44, 95  ;;  %vm158_vm7 = vcmp.lt.s32.totalorder %v52_v44, 94  ;;  %s311_s5 = sld [smem:[#allocation2 + $0x2]] }
   0xe   :  { %s312_s8 = sld [smem:[#allocation2 + $0x3]] }
  0x10   :  { %336 = vset.pattern.permute.xlu1 %v367_v4  ;;  %334 = vset.pattern.permute.xlu0 %v368_v5 }
  0x11   :  { %89 = vperm.xlu1 %336, %v33_v0   ;;  %59 = vperm.xlu0 %334, %v33_v0  }
  0x12   :  { %338 = vset.pattern.permute.xlu2 %v369_v6 }
  0x13   :  { %119 = vperm.xlu2 %338, %v33_v0  }
  0x19   :  { %339 = vset.pattern.permute.xlu1 %v370_v7  ;;  %341 = vset.pattern.permute.xlu0 %v371_v8 }
  0x1a   :  { %134 = vperm.xlu1 %339, %v33_v0   ;;  %36 = vperm.xlu0 %341, %v33_v0  }
  0x1b   :  { %340 = vset.pattern.permute.xlu2 %v372_v9 }
  0x1c   :  { %149 = vperm.xlu2 %340, %v33_v0  }
  0x22   :  { %342 = vset.pattern.permute.xlu0 %v372_v9 }
  0x64   :  { %v105_v17 = vpop.permute.xlu2 %104 }
  0x65   :  { %v108_v29 = vmul.f32 %v105_v17, %v32_v11  ;;  %v107_v30 = vmul.f32 %v105_v17, %v31_v10 }
  0x6d   :  { %v120_v23 = vpop.permute.xlu2 %119 }
  0x6e   :  { %v122_v25 = vmul.f32 %v120_v23, %v31_v10  ;;  %v123_v32 = vmul.f32 %v120_v23, %v32_v11 }
  0x76   :  { %v150_v33 = vpop.permute.xlu2 %149 }
  0x77   :  { %v153_v34 = vmul.f32 %v150_v33, %v32_v11  ;;  %v152_v35 = vmul.f32 %v150_v33, %v31_v10 }
  0x7a   :  { %v43_v12 = vpop.permute.xlu0 %42  ;;  %v75_v13 = vpop.permute.xlu1 %74 }
  0x7b   :  { %v45_v14 = vmul.f32 %v43_v12, %v31_v10  ;;  %v46_v15 = vmul.f32 %v43_v12, %v32_v11  ;;  %v77_v16 = vmul.f32 %v75_v13, %v31_v10  ;;  %v78_v26 = vmul.f32 %v75_v13, %v32_v11 }
  0x7d   :  { %49 = vrot.lane.b32.xlu2 %v46_v15, %s373_s21  ;;  %47 = vrot.lane.b32.xlu1 %v45_v14, %s373_s21 }
  0x7e   :  { %79 = vrot.lane.b32.xlu0 %v77_v16, %s374_s22 }
  0x83   :  { %v90_v18 = vpop.permute.xlu1 %89  ;;  %v60_v19 = vpop.permute.xlu0 %59 }
  0x84   :  { %v93_v20 = vmul.f32 %v90_v18, %v32_v11  ;;  %v62_v21 = vmul.f32 %v60_v19, %v31_v10  ;;  %v63_v22 = vmul.f32 %v60_v19, %v32_v11  ;;  %v92_v24 = vmul.f32 %v90_v18, %v31_v10 }
  0x86   :  { %66 = vrot.lane.b32.xlu2 %v63_v22, %s375_s23  ;;  %96 = vrot.lane.b32.xlu0 %v93_v20, %s376_s24 }
  0x87   :  { %64 = vrot.lane.b32.xlu1 %v62_v21, %s375_s23 }
  0x8c   :  { %v135_v27 = vpop.permute.xlu1 %134  ;;  %v37_v37 = vpop.permute.xlu0 %36 }
  0x8d   :  { %v138_v28 = vmul.f32 %v135_v27, %v32_v11  ;;  %v137_v31 = vmul.f32 %v135_v27, %v31_v10  ;;  %v39_v47 = vmul.f32 %v37_v37, %v31_v10  ;;  %v40_v48 = vmul.f32 %v37_v37, %v32_v11 }
  0x8e   :  { %94 = vrot.lane.b32.xlu2 %v92_v24, %s376_s24  ;;  %124 = vrot.lane.b32.xlu0 %v122_v25, %s377_s1 }
  0x8f   :  { %81 = vrot.lane.b32.xlu1 %v78_v26, %s374_s22 }
  0x96   :  { %111 = vrot.lane.b32.xlu2 %v108_v29, %s378_s25  ;;  %141 = vrot.lane.b32.xlu0 %v138_v28, %s379_s26 }
  0x97   :  { %109 = vrot.lane.b32.xlu1 %v107_v30, %s378_s25 }
  0x9e   :  { %139 = vrot.lane.b32.xlu2 %v137_v31, %s379_s26 }
  0x9f   :  { %126 = vrot.lane.b32.xlu1 %v123_v32, %s377_s1 }
  0xa6   :  { %156 = vrot.lane.b32.xlu2 %v153_v34, %s380_s27 }
  0xa7   :  { %154 = vrot.lane.b32.xlu1 %v152_v35, %s380_s27 }
  0xd7   :  { %v50_v36 = vpop.permute.xlu2 %49 }
  0xe0   :  { %v67_v39 = vpop.permute.xlu2 %66 }
  0xe8   :  { %v95_v42 = vpop.permute.xlu2 %94 }
  0xef   :  { %v48_v38 = vpop.permute.xlu1 %47 }
  0xf0   :  { %v80_v40 = vpop.permute.xlu0 %79  ;;  %v112_v49 = vpop.permute.xlu2 %111  ;;  %v54_v50 = vsel %vm53_vm0, %v48_v38, %v50_v36  ;;  %v55_v51 = vsel %vm53_vm0, %v50_v36, %v48_v38 }
  0xf1   :  { %v56_v54 = vadd.f32 %v54_v50, %v39_v47  ;;  %v57_v55 = vadd.f32 %v55_v51, %v40_v48  ;;  %v313_v51 = vld [vmem:[%s436_s2 + $0x10] ss:$8 sm:$0x3] }
  0xf8   :  { %v97_v45 = vpop.permute.xlu0 %96  ;;  %v140_v0 = vpop.permute.xlu2 %139 }
  0xf9   :  { %v65_v41 = vpop.permute.xlu1 %64  ;;  %v99_v1 = vsel %vm98_vm3, %v95_v42, %v97_v45  ;;  %v100_v2 = vsel %vm98_vm3, %v97_v45, %v95_v42 }
  0xfa   :  { %v69_v52 = vsel %vm68_vm1, %v65_v41, %v67_v39  ;;  %v70_v53 = vsel %vm68_vm1, %v67_v39, %v65_v41 }
  0xfb   :  { %v71_v59 = vadd.f32 %v69_v52, %v56_v54  ;;  %v72_v60 = vadd.f32 %v70_v53, %v57_v55  ;;  %v201_v52 = vstv %s27_s28 }
 0x100   :  { %v125_v61 = vpop.permute.xlu0 %124  ;;  %v157_v17 = vpop.permute.xlu2 %156 }
 0x101   :  { %v82_v46 = vpop.permute.xlu1 %81 }
 0x102   :  { %v84_v57 = vsel %vm83_vm2, %v80_v40, %v82_v46  ;;  %v85_v58 = vsel %vm83_vm2, %v82_v46, %v80_v40 }
 0x103   :  { %v86_v62 = vadd.f32 %v84_v57, %v71_v59  ;;  %v87_v63 = vadd.f32 %v85_v58, %v72_v60  ;;  %v209_v57 = vperm.slane %v313_v51, 0  ;;  %v210_v58 = vperm.slane %v313_v51, 1 }
 0x105   :  { %v102_v5 = vadd.f32 %v100_v2, %v87_v63  ;;  %v101_v6 = vadd.f32 %v99_v1, %v86_v62 }
 0x108   :  { %v142_v12 = vpop.permute.xlu0 %141 }
 0x109   :  { %v110_v56 = vpop.permute.xlu1 %109  ;;  %v144_v15 = vsel %vm143_vm6, %v140_v0, %v142_v12  ;;  %v145_v16 = vsel %vm143_vm6, %v142_v12, %v140_v0 }
 0x10a   :  { %v114_v3 = vsel %vm113_vm4, %v110_v56, %v112_v49  ;;  %v115_v4 = vsel %vm113_vm4, %v112_v49, %v110_v56 }
 0x10b   :  { %v116_v10 = vadd.f32 %v114_v3, %v101_v6  ;;  %v117_v11 = vadd.f32 %v115_v4, %v102_v5 }
 0x111   :  { %v127_v7 = vpop.permute.xlu1 %126 }
 0x112   :  { %v129_v8 = vsel %vm128_vm5, %v125_v61, %v127_v7  ;;  %v130_v9 = vsel %vm128_vm5, %v127_v7, %v125_v61 }
 0x113   :  { %v131_v13 = vadd.f32 %v129_v8, %v116_v10  ;;  %v132_v14 = vadd.f32 %v130_v9, %v117_v11 }
 0x115   :  { %v147_v18 = vadd.f32 %v145_v16, %v132_v14  ;;  %v146_v20 = vadd.f32 %v144_v15, %v131_v13 }
 0x119   :  { %v155_v19 = vpop.permute.xlu1 %154 }
 0x11a   :  { %v159_v21 = vsel %vm158_vm7, %v155_v19, %v157_v17  ;;  %v160_v22 = vsel %vm158_vm7, %v157_v17, %v155_v19 }
 0x11b   :  { %v161_v23 = vadd.f32 %v159_v21, %v146_v20  ;;  %v162_v24 = vadd.f32 %v160_v22, %v147_v18 }
 0x11d   :  { %v164_v25 = vsel %vm163_vm8, %v161_v23, 0.0  ;;  %v171_v26 = vsel %vm163_vm8, %v162_v24, 0.0  ;;  %v180_v27 = vrot.slane %v161_v23, 4  ;;  %v181_v28 = vrot.slane %v162_v24, 4 }
 0x11e   :  { %v165_v29 = vrot.slane %v164_v25, 4  ;;  %v172_v30 = vrot.slane %v171_v26, 4 }
 0x11f   :  { %v184_v31 = vsel %vm163_vm8, %v180_v27, 0.0  ;;  %v191_v32 = vsel %vm163_vm8, %v181_v28, 0.0 }
 0x120   :  { %v166_v33 = vadd.f32 %v165_v29, %v164_v25  ;;  %v173_v34 = vadd.f32 %v172_v30, %v171_v26  ;;  %v185_v35 = vrot.slane %v184_v31, 4  ;;  %v192_v36 = vrot.slane %v191_v32, 4 }
 0x122   :  { %v167_v37 = vrot.slane %v166_v33, 2  ;;  %v174_v38 = vrot.slane %v173_v34, 2  ;;  %v186_v39 = vadd.f32 %v185_v35, %v184_v31  ;;  %v193_v40 = vadd.f32 %v192_v36, %v191_v32 }
 0x124   :  { %v168_v41 = vadd.f32 %v167_v37, %v166_v33  ;;  %v175_v42 = vadd.f32 %v174_v38, %v173_v34  ;;  %v187_v43 = vrot.slane %v186_v39, 2  ;;  %v194_v44 = vrot.slane %v193_v40, 2 }
 0x125   :  { %v264_v38 = vstv %s310_s4 }
 0x126   :  { %v169_v45 = vrot.slane %v168_v41, 1  ;;  %v176_v46 = vrot.slane %v175_v42, 1  ;;  %v188_v47 = vadd.f32 %v187_v43, %v186_v39  ;;  %v195_v48 = vadd.f32 %v194_v44, %v193_v40  ;;  %v314_v43 = vld [vmem:[%s436_s2 + $0x11] ss:$8 sm:$0x3] }
 0x127   :  { %v270_v44 = vstv %s311_s5 }
 0x128   :  { %v189_v49 = vrot.slane %v188_v47, 1  ;;  %v196_v50 = vrot.slane %v195_v48, 1  ;;  %v170_v53 = vadd.f32 %v169_v45, %v168_v41  ;;  %v177_v54 = vadd.f32 %v176_v46, %v175_v42 }
 0x12a   :  { %v190_v55 = vadd.f32 %v189_v49, %v188_v47  ;;  %v197_v56 = vadd.f32 %v196_v50, %v195_v48  ;;  %v276_v49 = vperm.slane %v314_v43, 0  ;;  %v277_v50 = vperm.slane %v314_v43, 1 }
 0x12c   :  { %v199_v59 = vsel %vm198_vm9, %v170_v53, %v190_v55  ;;  %v200_v60 = vsel %vm198_vm9, %v177_v54, %v197_v56 }
 0x12d   :  { %v202_v61 = vadd.f32 %v201_v52, %v199_v59  ;;  %v203_v62 = vadd.f32 %v201_v52, %v200_v60 }
 0x12f   :  { %v213_v63 = vmul.f32 %v209_v57, %v202_v61  ;;  %v214_v0 = vmul.f32 %v210_v58, %v203_v62  ;;  %v287_v58 = vstv %s312_s8 }
 0x131   :  { %v215_v1 = vmul.f32 %v213_v63, %v213_v63  ;;  %v216_v2 = vmul.f32 %v214_v0, %v214_v0 }
 0x133   :  { %v219_v3 = vrot.slane %v215_v1, 6  ;;  %v220_v4 = vrot.slane %v216_v2, 6 }
 0x135   :  { %v224_v5 = vsel %vm223_vm10, %v213_v63, %v219_v3  ;;  %v225_v6 = vsel %vm223_vm10, %v214_v0, %v220_v4 }
 0x136   :  { %v226_v7 = vsel %vm163_vm8, %v224_v5, 0.0  ;;  %v227_v8 = vsel %vm163_vm8, %v225_v6, 0.0 }
 0x137   :  { %v228_v9 = vadd.f32 %v227_v8, %v226_v7 }
 0x139   :  { %229 = vadd.xlane.f32.xlu0 %v228_v9 }
 0x1ac   :  { %v230_v10 = vpop.xlane.xlu0 %229 }
 0x1ad   :  { %v231_v11 = vsel %vm223_vm10, %v230_v10, 0.0  ;;  %v239_v12 = vrot.slane %v230_v10, 2 }
 0x1ae   :  { %v232_v13 = vrot.slane %v231_v11, 4 }
 0x1af   :  { %v241_v14 = vsel %vm223_vm10, %v239_v12, 0.0 }
 0x1b0   :  { %v233_v15 = vadd.f32 %v232_v13, %v231_v11  ;;  %v242_v16 = vrot.slane %v241_v14, 4 }
 0x1b2   :  { %v234_v17 = vrot.slane %v233_v15, 2  ;;  %v243_v18 = vadd.f32 %v242_v16, %v241_v14 }
 0x1b4   :  { %v235_v19 = vadd.f32 %v234_v17, %v233_v15  ;;  %v244_v20 = vrot.slane %v243_v18, 2 }
 0x1b6   :  { %v236_v21 = vrot.slane %v235_v19, 1  ;;  %v245_v22 = vadd.f32 %v244_v20, %v243_v18 }
 0x1b8   :  { %v237_v23 = vadd.f32 %v236_v21, %v235_v19  ;;  %v246_v24 = vrot.slane %v245_v22, 1 }
 0x1ba   :  { %v247_v25 = vadd.f32 %v246_v24, %v245_v22  ;;  %v248_v26 = vmul.f32 0.0025510204, %v237_v23 }
 0x1bc   :  { %v249_v27 = vmul.f32 0.0025510204, %v247_v25  ;;  %v250_v28 = vmul.f32 %v248_v26, %v248_v26  ;;  %v266_v40 = vsub.f32 %v202_v61, %v248_v26  ;;  %v267_v41 = vsub.f32 %v203_v62, %v248_v26 }
 0x1be   :  { %v251_v29 = vsub.f32 %v249_v27, %v250_v28 }
 0x1c0   :  { %v252_v30 = vmax.f32 %v251_v29, 0.0 }
 0x1c2   :  { %v253_v31 = vadd.f32 2e-05, %v252_v30 }
 0x1c4   :  { %343 = vrsqrt.f32 %v253_v31  ;;  %vm260_vm12 = vweird.f32 %v253_v31 }
 0x1ca   :  { %v344_v32 = vpop.eup %343 }
 0x1cb   :  { %v255_v33 = vmul.f32 %v344_v32, %v253_v31  ;;  %vm261_vm11 = vweird.f32 %v344_v32 }
 0x1cc   :  { %vm262_vm13 = vmor %vm260_vm12, %vm261_vm11 }
 0x1cd   :  { %v256_v34 = vmul.f32 %v344_v32, %v255_v33 }
 0x1cf   :  { %v257_v35 = vmul.f32 0.5, %v256_v34 }
 0x1d1   :  { %v258_v36 = vsub.f32 1.5, %v257_v35 }
 0x1d3   :  { %v259_v37 = vmul.f32 %v344_v32, %v258_v36 }
 0x1d5   :  { %v263_v39 = vsel %vm262_vm13, %v344_v32, %v259_v37 }
 0x1d6   :  { %v265_v42 = vmul.f32 %v264_v38, %v263_v39 }
 0x1d8   :  { %v268_v45 = vmul.f32 %v266_v40, %v265_v42  ;;  %v269_v46 = vmul.f32 %v267_v41, %v265_v42 }
 0x1da   :  { %v271_v47 = vadd.f32 %v270_v44, %v268_v45  ;;  %v272_v48 = vadd.f32 %v270_v44, %v269_v46 }
 0x1dc   :  { %v273_v51 = vmax.f32 %v271_v47, 0.0  ;;  %v274_v52 = vmax.f32 %v272_v48, 0.0 }
 0x1de   :  { %v280_v53 = vmul.f32 %v276_v49, %v273_v51  ;;  %v281_v54 = vmul.f32 %v277_v50, %v274_v52 }
 0x1e0   :  { %v282_v55 = vsel %vm223_vm10, %v280_v53, 0.0  ;;  %v283_v56 = vsel %vm223_vm10, %v281_v54, 0.0 }
 0x1e1   :  { %v284_v57 = vadd.f32 %v283_v56, %v282_v55 }
 0x1e3   :  { %285 = vadd.xlane.f32.xlu1 %v284_v57 }
 0x256   :  { %v286_v59 = vpop.xlane.xlu1 %285 }
 0x257   :  { %v288_v60 = vadd.f32 %v287_v58, %v286_v59 }
 0x259   :  { %v289_v61 = vmin.f32 %v288_v60, 20.0  ;;  %vm301_vm0 = vcmp.gt.f32.partialorder %v288_v60, 20.0 }
 0x25b   :  { %v290_v62 = vmul.f32 1.442695, %v289_v61 }
 0x25d   :  { %345 = vpow2.f32 %v290_v62 }
 0x263   :  { %v346_v63 = vpop.eup %345 }
 0x264   :  { %v292_v0 = vadd.f32 1.0, %v346_v63  ;;  %v295_v1 = vmul.f32 -0.5, %v346_v63  ;;  %v298_v3 = vand.u32 2147483647, %v346_v63 }
 0x266   :  { %347 = vlog2.f32 %v292_v0  ;;  %v296_v2 = vadd.f32 1.0, %v295_v1  ;;  %vm299_vm15 = vcmp.lt.f32.partialorder %v298_v3, 0.0004427343 }
 0x268   :  { %v297_v6 = vmul.f32 %v346_v63, %v296_v2 }
 0x26c   :  { %v348_v4 = vpop.eup %347 }
 0x26d   :  { %v294_v5 = vmul.f32 0.6931472, %v348_v4 }
 0x26f   :  { %v300_v7 = vsel %vm299_vm15, %v297_v6, %v294_v5 }
 0x270   :  { %v302_v8 = vsel %vm301_vm0, %v288_v60, %v300_v7 }
 0x271   :  { %304 = vst.msk [vmem:[%s437_s3] sm:$0x3] %vm303_vm14, %v302_v8 }
 0x272   :  { %309 = vsyncpa [#allocation3], 1 }

</bundles_post_ra>
